<compile_context>
chip_gen: v7x
topology: tpu7x:2x2x1
jax: 0.10.0
libtpu: 0.0.40
codegen_flags: <defaults>
</compile_context>

<pallas_src>
import functools

import jax
import jax.numpy as jnp
from jax.experimental import pallas as pl
from jax.experimental.pallas import tpu as pltpu


def _cdiv(a, b):
    return -(-a // b)


def _round_up(a, b):
    return _cdiv(a, b) * b


def cltr_kernel(x_ref, w1bd_ref, b1t_ref, w2bd_ref, b2_ref, o_ref, *, chunk_r):
    # x_ref:    (TILE_R, G*F)  VMEM  -- G documents packed per (lane-dense) row
    # w1bd_ref: (G*F, G*W)     VMEM  -- block-diagonal replicated W1.T (resident)
    # b1t_ref:  (1,   G*W)     VMEM  -- b1 tiled G times
    # w2bd_ref: (G*W, G)       VMEM  -- block-diagonal replicated w2 column (resident)
    # b2_ref:   (1, 1)         SMEM  -- scalar output bias
    # o_ref:    (TILE_R, G)    VMEM  -- one score per packed document
    w1bd = w1bd_ref[...]
    b1t = b1t_ref[...]
    w2bd = w2bd_ref[...]
    b2 = b2_ref[0, 0]
    tile_r = x_ref.shape[0]
    # Static (fully unrolled) chunk loop: bounds the (chunk, G*W) f32 hidden
    # temp independently of the (large) DMA tile size.  All slice starts/sizes
    # are Python ints (multiples of 8) -> zero-cost static slices.
    for c0 in range(0, tile_r, chunk_r):
        cs = min(chunk_r, tile_r - c0)
        h = jnp.dot(x_ref[c0:c0 + cs, :], w1bd,
                    preferred_element_type=jnp.float32)          # (cs, G*W) on MXU, K = G*F
        h = jnp.maximum(h + b1t, 0.0)                            # bias bcast + ReLU on VPU
        out = jnp.dot(h, w2bd,
                      preferred_element_type=jnp.float32) + b2   # (cs, G) on MXU
        o_ref[c0:c0 + cs, :] = out.astype(o_ref.dtype)


@functools.partial(jax.jit, static_argnames=("tile_r", "chunk_r"))
def cltr_forward(x, w1, b1, w2, b2, *, tile_r=4096, chunk_r=1024):
    """CLTRModel forward.

    x:  (..., N, F)  ->  (..., N, 1)       (spec: (1, N, F) -> (1, N, 1))
    w1: (width, F), b1: (width,), w2: (1, width), b2: (1,)   (native PyTorch layouts)
    """
    lead = x.shape[:-1]
    f = int(x.shape[-1])
    width = int(w1.shape[0])
    n = 1
    for d in lead:
        n *= int(d)                          # total number of documents

    # Pack G docs per row so each row is (at least) lane-dense: G*F >= 128.
    g = 8 * max(1, _cdiv(128, 8 * f))
    gf, gw = g * f, g * width
    r = _cdiv(n, g)                          # packed rows

    x_flat = x.reshape(-1)                   # free (contiguous) flatten
    if r * g != n:
        # Ragged doc count: zero-pad only the flattened tail (the one path that
        # still performs a copy of x).
        x_flat = jnp.pad(x_flat, (0, r * g * f - n * f))
    x2d = x_flat.reshape(r, gf)              # free reshape: (R, G*F)

    # Tiny replicated block-diagonal weights (~130 KiB for F=16, W=32).
    eye_g = jnp.eye(g, dtype=w1.dtype)
    w1bd = jnp.kron(eye_g, w1.T)                     # (G*F, G*W)
    b1t = jnp.tile(b1, g).reshape(1, gw)             # (1, G*W)
    w2bd = jnp.kron(eye_g, w2.reshape(width, 1))     # (G*W, G)
    b2s = b2.reshape(1, 1)

    # Tile selection: as big as possible (amortize per-step overhead), but keep
    # >= 4 grid steps on medium problems so v7x's 2 TensorCores both get work.
    min_tile_r = 512
    r8 = _round_up(r, 8)
    tr = min(tile_r, r8)
    if r8 > 4 * min_tile_r:
        tr = min(tr, max(min_tile_r, _round_up(_cdiv(r8, 4), 8)))
    cr = min(chunk_r, tr)

    grid = (pl.cdiv(r, tr),)                 # partial trailing block handled by Pallas

    out2d = pl.pallas_call(
        functools.partial(cltr_kernel, chunk_r=cr),
        out_shape=jax.ShapeDtypeStruct((r, g), x.dtype),
        grid_spec=pltpu.PrefetchScalarGridSpec(
            num_scalar_prefetch=0,
            grid=grid,
            in_specs=[
                pl.BlockSpec((tr, gf), lambda i: (i, 0)),           # x tile (lane-dense rows)
                pl.BlockSpec((gf, gw), lambda i: (0, 0)),           # block-diag W1.T (resident)
                pl.BlockSpec((1, gw), lambda i: (0, 0)),            # tiled b1 (resident)
                pl.BlockSpec((gw, g), lambda i: (0, 0)),            # block-diag w2 (resident)
                pl.BlockSpec(memory_space=pltpu.MemorySpace.SMEM),  # b2 scalar
            ],
            out_specs=pl.BlockSpec((tr, g), lambda i: (i, 0)),
        ),
        compiler_params=pltpu.CompilerParams(
            dimension_semantics=("parallel",),
            # ~10 MiB used at default tiles; 48 MiB raises v5e's 16 MiB scoped
            # default and stays inside v7x's 64 MiB physical VMEM.
            vmem_limit_bytes=48 * 1024 * 1024,
        ),
    )(x2d, w1bd, b1t, w2bd, b2s)

    out_flat = out2d.reshape(-1)             # free reshape; doc order preserved
    if r * g != n:
        out_flat = out_flat[:n]              # drop padded docs (tiny output slice)
    return out_flat.reshape(*lead, 1)


def init_params(key, num_features, width, dtype=jnp.float32):
    """Deterministic init mirroring nn.Linear parameter shapes exactly."""
    k1, k2, k3, k4 = jax.random.split(key, 4)
    lim1 = 1.0 / (num_features ** 0.5)
    lim2 = 1.0 / (width ** 0.5)
    w1 = jax.random.uniform(k1, (width, num_features), dtype, -lim1, lim1)
    b1 = jax.random.uniform(k2, (width,), dtype, -lim1, lim1)
    w2 = jax.random.uniform(k3, (1, width), dtype, -lim2, lim2)
    b2 = jax.random.uniform(k4, (1,), dtype, -lim2, lim2)
    return w1, b1, w2, b2


def _reference(x, w1, b1, w2, b2):
    """Pure-JAX reference of the same math (PyTorch layouts: y = x @ W.T + b)."""
    f = x.shape[-1]
    x2d = x.reshape(-1, f)
    out = jnp.maximum(x2d @ w1.T + b1, 0.0) @ w2.T + b2
    return out.reshape(*x.shape[:-1], 1)


if __name__ == "__main__":
    num_features = 16
    width = 32

    key = jax.random.PRNGKey(0)
    kx1, kx2, kp = jax.random.split(key, 3)
    w1, b1, w2, b2 = init_params(kp, num_features, width)

    # Case 1: doc count divisible by the packing factor (fully copy-free path)
    # but NOT a multiple of the tile size -> exercises the partial trailing block.
    n1 = 200
    x1 = jax.random.normal(kx1, (1, n1, num_features), jnp.float32)
    out1 = jax.block_until_ready(cltr_forward(x1, w1, b1, w2, b2))
    assert out1.shape == (1, n1, 1), out1.shape
    assert jnp.allclose(out1, _reference(x1, w1, b1, w2, b2), atol=1e-5, rtol=1e-5)

    # Case 2: ragged doc count -> exercises the tail zero-pad path.
    n2 = 203
    x2 = jax.random.normal(kx2, (1, n2, num_features), jnp.float32)
    out2 = jax.block_until_ready(cltr_forward(x2, w1, b1, w2, b2))
    assert out2.shape == (1, n2, 1), out2.shape
    assert jnp.allclose(out2, _reference(x2, w1, b1, w2, b2), atol=1e-5, rtol=1e-5)

    print("KERNEL_OK")
</pallas_src>

<mosaic_0001>
module attributes {stable_mosaic.version = 11 : i64} {
  func.func @cltr_kernel(%arg0: i32, %arg1: memref<32x128xf32, #tpu.memory_space<vmem>>, %arg2: memref<128x256xf32, #tpu.memory_space<vmem>>, %arg3: memref<1x256xf32, #tpu.memory_space<vmem>>, %arg4: memref<256x8xf32, #tpu.memory_space<vmem>>, %arg5: memref<1x1xf32, #tpu.memory_space<smem>>, %arg6: memref<32x8xf32, #tpu.memory_space<vmem>>) attributes {dimension_semantics = [#tpu.dimension_semantics<parallel>], iteration_bounds = array<i64: 1>, scalar_prefetch = 0 : i64, scratch_operands = 0 : i64, tpu.core_type = #tpu.core_type<tc>, window_params = [{transform_indices = @transform_0, window_bounds = array<i64: 32, 128>}, {pipeline_mode = #tpu.pipeline_mode<synchronous>, transform_indices = @transform_1, window_bounds = array<i64: 128, 256>}, {pipeline_mode = #tpu.pipeline_mode<synchronous>, transform_indices = @transform_2, window_bounds = array<i64: 1, 256>}, {pipeline_mode = #tpu.pipeline_mode<synchronous>, transform_indices = @transform_3, window_bounds = array<i64: 256, 8>}, {transform_indices = @transform_4, window_bounds = array<i64: 1, 1>}, {transform_indices = @transform_5, window_bounds = array<i64: 32, 8>}]} {
    %c0 = arith.constant 0 : index
    %c0_0 = arith.constant 0 : index
    %0 = vector.load %arg2[%c0, %c0_0] : memref<128x256xf32, #tpu.memory_space<vmem>>, vector<128x256xf32>
    %c0_1 = arith.constant 0 : index
    %c0_2 = arith.constant 0 : index
    %1 = vector.load %arg3[%c0_1, %c0_2] : memref<1x256xf32, #tpu.memory_space<vmem>>, vector<1x256xf32>
    %c0_3 = arith.constant 0 : index
    %c0_4 = arith.constant 0 : index
    %2 = vector.load %arg4[%c0_3, %c0_4] : memref<256x8xf32, #tpu.memory_space<vmem>>, vector<256x8xf32>
    %c0_5 = arith.constant 0 : index
    %c0_6 = arith.constant 0 : index
    %3 = memref.load %arg5[%c0_5, %c0_6] : memref<1x1xf32, #tpu.memory_space<smem>>
    %c0_7 = arith.constant 0 : index
    %c0_8 = arith.constant 0 : index
    %4 = vector.load %arg1[%c0_7, %c0_8] : memref<32x128xf32, #tpu.memory_space<vmem>>, vector<32x128xf32>
    %cst = arith.constant dense<0.000000e+00> : vector<32x256xf32>
    %5 = tpu.matmul %4, %0, %cst {dimension_numbers = #tpu.dot_dimension_numbers<[1], [0], [0], [1], [0, 0, 1, 1], [], []>} : vector<32x128xf32>, vector<128x256xf32>, vector<32x256xf32> -> vector<32x256xf32>
    %6 = vector.broadcast %1 : vector<1x256xf32> to vector<32x256xf32>
    %7 = arith.addf %5, %6 : vector<32x256xf32>
    %cst_9 = arith.constant 0.000000e+00 : f32
    %8 = vector.broadcast %cst_9 : f32 to vector<32x256xf32>
    %9 = arith.maximumf %7, %8 : vector<32x256xf32>
    %cst_10 = arith.constant dense<0.000000e+00> : vector<32x8xf32>
    %10 = tpu.matmul %9, %2, %cst_10 {dimension_numbers = #tpu.dot_dimension_numbers<[1], [0], [0], [1], [0, 0, 1, 1], [], []>} : vector<32x256xf32>, vector<256x8xf32>, vector<32x8xf32> -> vector<32x8xf32>
    %11 = vector.broadcast %3 : f32 to vector<32x8xf32>
    %12 = arith.addf %10, %11 : vector<32x8xf32>
    %c0_11 = arith.constant 0 : index
    %c0_12 = arith.constant 0 : index
    %13 = vector.load %arg6[%c0_11, %c0_12] : memref<32x8xf32, #tpu.memory_space<vmem>>, vector<32x8xf32>
    tpu.vector_store %arg6[%c0_11, %c0_12], %12 {strides = array<i32>} : memref<32x8xf32, #tpu.memory_space<vmem>>, vector<32x8xf32>,
    return
  }
  func.func @transform_0(%arg0: i32) -> (i32, i32) {
    %c0_i32 = arith.constant 0 : i32
    %c0_i32_0 = arith.constant 0 : i32
    return %arg0, %c0_i32 : i32, i32
  }
  func.func @transform_1(%arg0: i32) -> (i32, i32) {
    %c0_i32 = arith.constant 0 : i32
    %c0_i32_0 = arith.constant 0 : i32
    %c0_i32_1 = arith.constant 0 : i32
    return %c0_i32, %c0_i32_0 : i32, i32
  }
  func.func @transform_2(%arg0: i32) -> (i32, i32) {
    %c0_i32 = arith.constant 0 : i32
    %c0_i32_0 = arith.constant 0 : i32
    %c0_i32_1 = arith.constant 0 : i32
    return %c0_i32, %c0_i32_0 : i32, i32
  }
  func.func @transform_3(%arg0: i32) -> (i32, i32) {
    %c0_i32 = arith.constant 0 : i32
    %c0_i32_0 = arith.constant 0 : i32
    %c0_i32_1 = arith.constant 0 : i32
    return %c0_i32, %c0_i32_0 : i32, i32
  }
  func.func @transform_4(%arg0: i32) -> (i32, i32) {
    %c0_i32 = arith.constant 0 : i32
    %c0_i32_0 = arith.constant 0 : i32
    %c0_i32_1 = arith.constant 0 : i32
    return %c0_i32, %c0_i32_0 : i32, i32
  }
  func.func @transform_5(%arg0: i32) -> (i32, i32) {
    %c0_i32 = arith.constant 0 : i32
    %c0_i32_0 = arith.constant 0 : i32
    return %arg0, %c0_i32 : i32, i32
  }
}

</mosaic_0001>

<bundles_post_ra>
// kernel: tile.9
= control target key start
LH: loop header
LB: loop body
LE: loop exit
PB: predicated region body
PF: predicated region fallthrough
CT: control target
= control target key end

     0   :  { %s7_s6 = smov 3  ;;  %s14_s9 = smov 3  ;;  %vm4_vm0 = vcmask 261120   ;;  %vm11_vm1 = vcmask 1048320   ;;  %vm18_vm2 = vcmask 785920   ;;  %vm25_vm3 = vcmask 523520   ;;  %s76_s0 = inlined_call_operand.vmem [shape: f32[8,32], index: 0, kind: input, shape index: {}]   ;;  %s77_s1 = inlined_call_operand.vmem [shape: f32[1,256], index: 1, kind: output, shape index: {}]  }
   0x1   :  { %v38_v0 = vld [vmem:[%s76_s0 + $0x3] ss:$4 sm:%s7_s6]   ;;  %s45_s10 = smov 96   ;;  %s21_s11 = smov 3  ;;  %v39_v1 = vld [vmem:[%s76_s0 + $0x2] ss:$4 sm:%s14_s9]  }
   0x2   :  { %9 = vrot.lane.b32.xlu0 %v38_v0, %s45_s10  ;;  %v40_v2 = vld [vmem:[%s76_s0 + $0x1] ss:$4 sm:%s21_s11]   ;;  %s2_s16 = smov 3  ;;  %s46_s17 = smov 32  }
   0x3   :  { %23 = vrot.lane.b32.xlu1 %v40_v2, %s46_s17  ;;  %v3_v3 = vld [vmem:[%s76_s0] ss:$4 sm:%s2_s16]   ;;  %s47_s0 = smov 64  }
   0x4   :  { %5 = vst.msk [vmem:[#allocation0] ss:$8 sm:$0x3] %vm4_vm0, %v3_v3  }
   0x6   :  { %16 = vrot.lane.b32.xlu0 %v39_v1, %s47_s0 }
  0x74   :  { %v10_v4 = vpop.permute.xlu0 %9  }
  0x75   :  { %12 = vst.msk [vmem:[#allocation0] ss:$8 sm:$0x3] %vm11_vm1, %v10_v4   ;;  %v24_v5 = vpop.permute.xlu1 %23  }
  0x78   :  { %v17_v6 = vpop.permute.xlu0 %16  }
  0x79   :  { %19 = vst.msk [vmem:[#allocation0] ss:$8 sm:$0x3] %vm18_vm2, %v17_v6  }
  0x7a   :  { %26 = vst.msk [vmem:[#allocation0] ss:$8 sm:$0x3] %vm25_vm3, %v24_v5  }
  0x81   :  { %v30_v7 = vld [vmem:[#allocation0] sm:$0x1]  ;;  %v34_v8 = vld [vmem:[#allocation0 + $0x8] sm:$0x1] }
  0x82   :  { %32 = vst [vmem:[%s77_s1] sm:$0x1] %v30_v7  ;;  %41 = vst [vmem:[%s77_s1 + $0x1] sm:$0x1] %v34_v8 }

// kernel: cltr_forward.1
= control target key start
LH: loop header
LB: loop body
LE: loop exit
PB: predicated region body
PF: predicated region fallthrough
CT: control target
= control target key end

     0   :  { %v403_v3 = vmov 0.0   ;;  %vm285_vm0 = vcmask 64512   ;;  %s664_s1 = inlined_call_operand.vmem [shape: f32[128,256], index: 1, kind: input, shape index: {}]   ;;  %s665_s3 = inlined_call_operand.vmem [shape: f32[256,8], index: 3, kind: input, shape index: {}]   ;;  %s666_s0 = inlined_call_operand.vmem [shape: f32[25,128], index: 0, kind: input, shape index: {}]   ;;  %s667_s2 = inlined_call_operand.vmem [shape: f32[1,256], index: 2, kind: input, shape index: {}]   ;;  %s668_s4 = inlined_call_operand.<no memory space> [shape: f32[1,1], index: 4, kind: input, shape index: {}]   ;;  %s669_s5 = inlined_call_operand.vmem [shape: f32[25,8], index: 5, kind: output, shape index: {}]  }
   0x1   :  { %v22_v0 = vld [vmem:[%s664_s1 + $0x8] sm:$0xff]  ;;  %v24_v1 = vld [vmem:[%s664_s1 + $0x18] sm:$0xff]  ;;  %v21_v2 = vld [vmem:[%s664_s1] sm:$0xff]  ;;  %166 = vmatprep.mubr.f32.mxu0 %v403_v3 }
   0x2   :  { %v338_v4 = vpack.c.bf16 %v24_v1, %v22_v0  ;;  %v23_v5 = vld [vmem:[%s664_s1 + $0x10] sm:$0xff]  ;;  %v26_v6 = vld [vmem:[%s664_s1 + $0x28] sm:$0xff]  ;;  %v28_v7 = vld [vmem:[%s664_s1 + $0x38] sm:$0xff] }
   0x3   :  { %v340_v8 = vpack.c.bf16 %v23_v5, %v21_v2  ;;  %v342_v9 = vpack.c.bf16 %v28_v7, %v26_v6  ;;  %v25_v10 = vld [vmem:[%s664_s1 + $0x20] sm:$0xff]  ;;  %v27_v11 = vld [vmem:[%s664_s1 + $0x30] sm:$0xff]  ;;  %v30_v12 = vld [vmem:[%s664_s1 + $0x48] sm:$0xff] }
   0x4   :  { %339 = vmatprep.subr.bf16.mxu0 %v338_v4  ;;  %v32_v13 = vld [vmem:[%s664_s1 + $0x58] sm:$0xff]  ;;  %v344_v14 = vpack.c.bf16 %v27_v11, %v25_v10  ;;  %v29_v16 = vld [vmem:[%s664_s1 + $0x40] sm:$0xff]  ;;  %v31_v17 = vld [vmem:[%s664_s1 + $0x50] sm:$0xff] }
   0x5   :  { %341 = vmatpush1.bf16.msra.mxu0 %v340_v8  ;;  %v346_v15 = vpack.c.bf16 %v32_v13, %v30_v12  ;;  %v34_v18 = vld [vmem:[%s664_s1 + $0x68] sm:$0xff]  ;;  %v36_v19 = vld [vmem:[%s664_s1 + $0x78] sm:$0xff]  ;;  %v348_v20 = vpack.c.bf16 %v31_v17, %v29_v16  ;;  %v33_v22 = vld [vmem:[%s664_s1 + $0x60] sm:$0xff] }
   0x6   :  { %343 = vmatprep.subr.bf16.mxu0 %v342_v9  ;;  %v350_v21 = vpack.c.bf16 %v36_v19, %v34_v18  ;;  %v35_v23 = vld [vmem:[%s664_s1 + $0x70] sm:$0xff]  ;;  %v38_v24 = vld [vmem:[%s664_s1 + $0x88] sm:$0xff]  ;;  %v40_v25 = vld [vmem:[%s664_s1 + $0x98] sm:$0xff] }
   0x7   :  { %v37_v26 = vld [vmem:[%s664_s1 + $0x80] sm:$0xff]  ;;  %v39_v27 = vld [vmem:[%s664_s1 + $0x90] sm:$0xff]  ;;  %v352_v28 = vpack.c.bf16 %v35_v23, %v33_v22  ;;  %v42_v29 = vld [vmem:[%s664_s1 + $0xa8] sm:$0xff]  ;;  %v354_v34 = vpack.c.bf16 %v40_v25, %v38_v24 }
   0x8   :  { %v44_v30 = vld [vmem:[%s664_s1 + $0xb8] sm:$0xff]  ;;  %v70_v31 = vld [vmem:[%s665_s3 + $0x80] sm:$0xff]  ;;  %v71_v32 = vld [vmem:[%s665_s3 + $0x88] sm:$0xff]  ;;  %v356_v45 = vpack.c.bf16 %v39_v27, %v37_v26 }
   0x9   :  { %345 = vmatpush1.bf16.msra.mxu0 %v344_v14  ;;  %v54_v33 = vld [vmem:[%s665_s3] sm:$0xff]  ;;  %v370_v35 = vpack.c.bf16 %v71_v32, %v70_v31  ;;  %v55_v36 = vld [vmem:[%s665_s3 + $0x8] sm:$0xff]  ;;  %v72_v37 = vld [vmem:[%s665_s3 + $0x90] sm:$0xff]  ;;  %v358_v49 = vpack.c.bf16 %v44_v30, %v42_v29 }
   0xa   :  { %347 = vmatprep.subr.bf16.mxu0 %v346_v15  ;;  %v73_v38 = vld [vmem:[%s665_s3 + $0x98] sm:$0xff]  ;;  %v372_v39 = vpack.c.bf16 %v55_v36, %v54_v33  ;;  %v56_v41 = vld [vmem:[%s665_s3 + $0x10] sm:$0xff]  ;;  %v74_v43 = vld [vmem:[%s665_s3 + $0xa0] sm:$0xff] }
   0xb   :  { %v374_v40 = vpack.c.bf16 %v73_v38, %v72_v37  ;;  %v57_v42 = vld [vmem:[%s665_s3 + $0x18] sm:$0xff]  ;;  %371 = vmatprep.subr.bf16.mxu1 %v370_v35  ;;  %v75_v44 = vld [vmem:[%s665_s3 + $0xa8] sm:$0xff]  ;;  %v41_v46 = vld [vmem:[%s664_s1 + $0xa0] sm:$0xff]  ;;  %v92_v37 = vlaneseq }
   0xc   :  { %v43_v47 = vld [vmem:[%s664_s1 + $0xb0] sm:$0xff]  ;;  %373 = vmatpush3.bf16.msra.mxu1 %v372_v39  ;;  %v376_v48 = vpack.c.bf16 %v57_v42, %v56_v41  ;;  %v46_v50 = vld [vmem:[%s664_s1 + $0xc8] sm:$0xff]  ;;  %v378_v51 = vpack.c.bf16 %v75_v44, %v74_v43  ;;  %v58_v52 = vld [vmem:[%s665_s3 + $0x20] sm:$0xff] }
   0xd   :  { %349 = vmatpush1.bf16.msra.mxu0 %v348_v20  ;;  %375 = vmatprep.subr.bf16.mxu1 %v374_v40  ;;  %v59_v53 = vld [vmem:[%s665_s3 + $0x28] sm:$0xff]  ;;  %v48_v54 = vld [vmem:[%s664_s1 + $0xd8] sm:$0xff]  ;;  %v76_v55 = vld [vmem:[%s665_s3 + $0xb0] sm:$0xff]  ;;  %v360_v57 = vpack.c.bf16 %v43_v47, %v41_v46  ;;  %v93_v38 = vshrl.u32 %v92_v37, 7 }
   0xe   :  { %351 = vmatprep.subr.bf16.mxu0 %v350_v21  ;;  %v77_v56 = vld [vmem:[%s665_s3 + $0xb8] sm:$0xff]  ;;  %v45_v58 = vld [vmem:[%s664_s1 + $0xc0] sm:$0xff]  ;;  %v47_v59 = vld [vmem:[%s664_s1 + $0xd0] sm:$0xff]  ;;  %v380_v60 = vpack.c.bf16 %v59_v53, %v58_v52  ;;  %v362_v61 = vpack.c.bf16 %v48_v54, %v46_v50 }
   0xf   :  { %v50_v62 = vld [vmem:[%s664_s1 + $0xe8] sm:$0xff]  ;;  %v382_v63 = vpack.c.bf16 %v77_v56, %v76_v55  ;;  %v60_v0 = vld [vmem:[%s665_s3 + $0x30] sm:$0xff]  ;;  %v61_v1 = vld [vmem:[%s665_s3 + $0x38] sm:$0xff]  ;;  %v364_v6 = vpack.c.bf16 %v47_v59, %v45_v58  ;;  %v94_v39 = vsub.s32 0, %v93_v38  ;;  %v98_v41 = vsub.s32 1, %v93_v38 }
  0x10   :  { %377 = vmatpush3.bf16.msra.mxu1 %v376_v48  ;;  %v52_v2 = vld [vmem:[%s664_s1 + $0xf8] sm:$0xff]  ;;  %v78_v4 = vld [vmem:[%s665_s3 + $0xc0] sm:$0xff]  ;;  %v79_v5 = vld [vmem:[%s665_s3 + $0xc8] sm:$0xff]  ;;  %v384_v8 = vpack.c.bf16 %v61_v1, %v60_v0 }
  0x11   :  { %353 = vmatpush1.bf16.msra.mxu0 %v352_v28  ;;  %379 = vmatprep.subr.bf16.mxu1 %v378_v51  ;;  %v49_v7 = vld [vmem:[%s664_s1 + $0xe0] sm:$0xff]  ;;  %v366_v9 = vpack.c.bf16 %v52_v2, %v50_v62  ;;  %v51_v10 = vld [vmem:[%s664_s1 + $0xf0] sm:$0xff]  ;;  %v386_v11 = vpack.c.bf16 %v79_v5, %v78_v4  ;;  %v63_v13 = vld [vmem:[%s665_s3 + $0x48] sm:$0xff] }
  0x12   :  { %355 = vmatprep.subr.bf16.mxu0 %v354_v34  ;;  %v62_v12 = vld [vmem:[%s665_s3 + $0x40] sm:$0xff]  ;;  %v80_v14 = vld [vmem:[%s665_s3 + $0xd0] sm:$0xff]  ;;  %v81_v15 = vld [vmem:[%s665_s3 + $0xd8] sm:$0xff]  ;;  %v368_v16 = vpack.c.bf16 %v51_v10, %v49_v7 }
  0x13   :  { %v388_v17 = vpack.c.bf16 %v63_v13, %v62_v12  ;;  %v390_v18 = vpack.c.bf16 %v81_v15, %v80_v14  ;;  %v64_v19 = vld [vmem:[%s665_s3 + $0x50] sm:$0xff]  ;;  %v65_v20 = vld [vmem:[%s665_s3 + $0x58] sm:$0xff]  ;;  %v82_v21 = vld [vmem:[%s665_s3 + $0xe0] sm:$0xff] }
  0x14   :  { %381 = vmatpush3.bf16.msra.mxu1 %v380_v60  ;;  %v83_v22 = vld [vmem:[%s665_s3 + $0xe8] sm:$0xff]  ;;  %v87_v23 = vld [vmem:[%s666_s0] sm:$0xff]  ;;  %v392_v24 = vpack.c.bf16 %v65_v20, %v64_v19  ;;  %v89_v27 = vld [vmem:[%s666_s0 + $0x10] sm:$0xff] }
  0x15   :  { %357 = vmatpush1.bf16.msra.mxu0 %v356_v45  ;;  %383 = vmatprep.subr.bf16.mxu1 %v382_v63  ;;  %v394_v25 = vpack.c.bf16 %v83_v22, %v82_v21  ;;  %v88_v26 = vld [vmem:[%s666_s0 + $0x8] sm:$0xff]  ;;  %v90_v28 = vld [vmem:[%s666_s0 + $0x18] sm:$0xff]  ;;  %v66_v29 = vld [vmem:[%s665_s3 + $0x60] sm:$0xff] }
  0x16   :  { %359 = vmatprep.subr.bf16.mxu0 %v358_v49  ;;  %v67_v30 = vld [vmem:[%s665_s3 + $0x68] sm:$0xff]  ;;  %v84_v32 = vld [vmem:[%s665_s3 + $0xf0] sm:$0xff]  ;;  %v69_v35 = vld [vmem:[%s665_s3 + $0x78] sm:$0xff] }
  0x17   :  { %v396_v31 = vpack.c.bf16 %v67_v30, %v66_v29  ;;  %v68_v34 = vld [vmem:[%s665_s3 + $0x70] sm:$0xff]  ;;  %v53_v40 = vld [vmem:[%s667_s2] sm:$0x3] }
  0x18   :  { %385 = vmatpush3.bf16.msra.mxu1 %v384_v8  ;;  %v400_v36 = vpack.c.bf16 %v69_v35, %v68_v34  ;;  %v95_v42 = vrot.slane %v53_v40, %v94_v39  ;;  %v99_v43 = vrot.slane %v53_v40, %v98_v41 }
  0x19   :  { %361 = vmatpush1.bf16.msra.mxu0 %v360_v57  ;;  %387 = vmatprep.subr.bf16.mxu1 %v386_v11 }
  0x1a   :  { %363 = vmatprep.subr.bf16.mxu0 %v362_v61 }
  0x1c   :  { %389 = vmatpush3.bf16.msra.mxu1 %v388_v17 }
  0x1d   :  { %365 = vmatpush1.bf16.msra.mxu0 %v364_v6  ;;  %391 = vmatprep.subr.bf16.mxu1 %v390_v18  ;;  %v199_v6 = vstv %s668_s4 }
  0x1e   :  { %367 = vmatprep.subr.bf16.mxu0 %v366_v9 }
  0x20   :  { %393 = vmatpush3.bf16.msra.mxu1 %v392_v24 }
  0x21   :  { %369 = vmatpush1.bf16.msra.mxu0 %v368_v16  ;;  %395 = vmatprep.subr.bf16.mxu1 %v394_v25 }
  0x24   :  { %167 = vmatmul.mubr.f32.vlgmr.msra.gmra.mrb[0].mxu0 %v87_v23  ;;  %397 = vmatpush3.bf16.msra.mxu1 %v396_v31 }
  0x25   :  { %172 = vmatprep.mubr.f32.mxu0 %v403_v3 }
  0x28   :  { %173 = vmatmul.mubr.f32.gmra.mrb[2].mxu0 %v88_v26 }
  0x29   :  { %178 = vmatprep.mubr.f32.mxu0 %v403_v3 }
  0x2c   :  { %179 = vmatmul.mubr.f32.gmra.mrb[4].mxu0 %v89_v27 }
  0x2d   :  { %184 = vmatprep.mubr.f32.mxu0 %v403_v3  ;;  %v85_v3 = vld [vmem:[%s665_s3 + $0xf8] sm:$0xff] }
  0x2e   :  { %v398_v33 = vpack.c.bf16 %v85_v3, %v84_v32 }
  0x30   :  { %185 = vmatmul.mubr.f32.gmra.mrb[6].mxu0 %v90_v28  ;;  %399 = vmatprep.subr.bf16.mxu1 %v398_v33 }
  0x31   :  { %401 = vmatpush3.bf16.msra.mxu1 %v400_v36 }
  0xf7   :  { %v168_v44 = vpop.f32.mrb[0].mxu0 }
  0xf8   :  { %v169_v45 = vadd.f32 %v168_v44, %v95_v42  ;;  %v170_v46 = vpop.f32.mrb[1].mxu0 }
  0xf9   :  { %v171_v47 = vadd.f32 %v170_v46, %v99_v43 }
  0xfa   :  { %v191_v50 = vmax.f32 %v169_v45, 0.0 }
  0xfb   :  { %v174_v48 = vpop.f32.mrb[2].mxu0  ;;  %v192_v49 = vmax.f32 %v171_v47, 0.0 }
  0xfc   :  { %v175_v51 = vadd.f32 %v174_v48, %v95_v42  ;;  %v176_v52 = vpop.f32.mrb[3].mxu0 }
  0xfd   :  { %v177_v53 = vadd.f32 %v176_v52, %v99_v43  ;;  %264 = vmatprep.mubr.f32.mxu1 %v192_v49 }
  0xfe   :  { %265 = vmatmul.mubr.f32.vlgmr.msra.gmra.mrb[0].mxu1 %v191_v50  ;;  %v193_v56 = vmax.f32 %v175_v51, 0.0 }
  0xff   :  { %v194_v54 = vmax.f32 %v177_v53, 0.0  ;;  %v180_v55 = vpop.f32.mrb[4].mxu0 }
 0x100   :  { %v181_v57 = vadd.f32 %v180_v55, %v95_v42  ;;  %v182_v58 = vpop.f32.mrb[5].mxu0 }
 0x101   :  { %v183_v59 = vadd.f32 %v182_v58, %v99_v43  ;;  %269 = vmatprep.mubr.f32.mxu1 %v194_v54 }
 0x102   :  { %270 = vmatmul.mubr.f32.gmra.mrb[2].mxu1 %v193_v56  ;;  %v195_v62 = vmax.f32 %v181_v57, 0.0 }
 0x103   :  { %v196_v60 = vmax.f32 %v183_v59, 0.0  ;;  %v186_v61 = vpop.f32.mrb[6].mxu0 }
 0x104   :  { %v187_v63 = vadd.f32 %v186_v61, %v95_v42  ;;  %v188_v0 = vpop.f32.mrb[7].mxu0 }
 0x105   :  { %v189_v1 = vadd.f32 %v188_v0, %v99_v43  ;;  %274 = vmatprep.mubr.f32.mxu1 %v196_v60 }
 0x106   :  { %275 = vmatmul.mubr.f32.gmra.mrb[4].mxu1 %v195_v62  ;;  %v197_v4 = vmax.f32 %v187_v63, 0.0 }
 0x107   :  { %v198_v2 = vmax.f32 %v189_v1, 0.0 }
 0x109   :  { %279 = vmatprep.mubr.f32.mxu1 %v198_v2 }
 0x10a   :  { %280 = vmatmul.mubr.f32.gmra.mrb[6].mxu1 %v197_v4 }
 0x1d1   :  { %v326_v5 = vpop.f32.mrb[0].mxu1 }
 0x1d2   :  { %v327_v7 = vpop.f32.mrb[1].mxu1 }
 0x1d3   :  { %v328_v8 = vadd.f32 %v327_v7, %v326_v5 }
 0x1d5   :  { %v267_v9 = vadd.f32 %v328_v8, %v199_v6  ;;  %v329_v10 = vpop.f32.mrb[2].mxu1 }
 0x1d6   :  { %v330_v11 = vpop.f32.mrb[3].mxu1 }
 0x1d7   :  { %286 = vst.msk [vmem:[%s669_s5] sm:$0xff] %vm285_vm0, %v267_v9  ;;  %v331_v12 = vadd.f32 %v330_v11, %v329_v10 }
 0x1d9   :  { %v272_v13 = vadd.f32 %v331_v12, %v199_v6  ;;  %v332_v14 = vpop.f32.mrb[4].mxu1 }
 0x1da   :  { %v333_v15 = vpop.f32.mrb[5].mxu1 }
 0x1db   :  { %287 = vst.msk [vmem:[%s669_s5 + $0x8] sm:$0xff] %vm285_vm0, %v272_v13  ;;  %v334_v16 = vadd.f32 %v333_v15, %v332_v14 }
 0x1dd   :  { %v277_v17 = vadd.f32 %v334_v16, %v199_v6  ;;  %v335_v18 = vpop.f32.mrb[6].mxu1 }
 0x1de   :  { %v336_v19 = vpop.f32.mrb[7].mxu1 }
 0x1df   :  { %288 = vst.msk [vmem:[%s669_s5 + $0x10] sm:$0xff] %vm285_vm0, %v277_v17  ;;  %v337_v20 = vadd.f32 %v336_v19, %v335_v18 }
 0x1e1   :  { %v282_v21 = vadd.f32 %v337_v20, %v199_v6 }
 0x1e3   :  { %289 = vst.msk [vmem:[%s669_s5 + $0x18] sm:$0xff] %vm285_vm0, %v282_v21 }

</bundles_post_ra>
